<compile_context>
chip_gen: v5e
topology: v5e:2x2
jax: 0.10.0
libtpu: 0.0.40
codegen_flags: <defaults>
</compile_context>

<pallas_src>
import jax
import jax.numpy as jnp
import numpy as np
from jax.experimental import pallas as pl
from jax.experimental.pallas import tpu as pltpu

IN_FEATURES = 12
HIDDEN = 64
OUT_FEATURES = 2
LANES = 128  # lane width; multi-step batch tiles are multiples of this


def _round_up(n, m):
    return -(-n // m) * m


def _mlp_kernel(x_ref, w1_ref, b1_ref, w2_ref, b2_ref, o_ref):
    # x_ref: (bb, 12) batch-major tile, exactly as it lies in HBM (no wrapper transpose).
    # Transpose the small tile on-chip so the batch lands on the 128-wide lane axis; the
    # XLU is otherwise idle in this kernel, so this is effectively free.
    x_t = jnp.transpose(x_ref[...])                                       # (12, bb)
    # Layer 1 on the MXU, f32 accumulation (native bf16 MXU path when I/O is bf16).
    h = jnp.dot(w1_ref[...], x_t, preferred_element_type=jnp.float32)     # (64, bb)
    h = jnp.maximum(h + b1_ref[...], 0.0)                                 # b1 (64,1) bcast over lanes
    # Layer 2 (2x64) also on the MXU; its poor utilisation is free since the kernel is
    # DMA/overhead-bound.  (Move to VPU+XLU only if a bundle dump shows the MRF pop binding.)
    y = jnp.dot(w2_ref[...], h.astype(w2_ref.dtype),
                preferred_element_type=jnp.float32)                       # (2, bb)
    y = y + b2_ref[...]                                                   # b2 (2,1)
    o_ref[...] = y.astype(o_ref.dtype)                                    # lane-dense, unmasked vst


def _pick_batch_tile(B, block_b):
    if B > block_b:
        return block_b                       # multi-step grid; Pallas masks the ragged tail
    if B >= 2 * LANES:
        # Still emit an even 2 lane-aligned grid steps so dimension_semantics=("parallel",)
        # can spread the batch over both v7x TensorCores.
        return _round_up(-(-B // 2), LANES)
    return B                                 # single full-extent block (always legal)


def soccer_goal_predictor(x, w1, b1, w2, b2, *, block_b=8192,
                          feature_major_out=False, vmem_limit_bytes=None):
    """Forward pass of SoccerGoalPredictor.

    x: (B, 12) batch-major, f32 or bf16.  w1: (64, 12), w2: (2, 64) in PyTorch (out, in)
    layout; b1/b2 in PyTorch (out,) layout (or (out, 1)).  Returns (B, 2) in x.dtype, or
    the kernel-native lane-dense (2, B) when feature_major_out=True (lets a consumer fold
    away the final transpose).  Note: bf16 x quantizes the features themselves, so results
    can flip near the ReLU boundary.
    """
    assert x.ndim == 2 and x.shape[1] == IN_FEATURES, x.shape
    assert block_b % LANES == 0, "batch tile must be a multiple of the 128-lane width"
    B = x.shape[0]
    io_dtype = x.dtype

    # Weights: tiny one-off cast to the I/O dtype keeps the MXU on its native path
    # (bf16 x bf16 -> f32 accumulate for bf16 inputs).  Biases stay f32 (added post-dot).
    w1 = jnp.asarray(w1).astype(io_dtype)
    w2 = jnp.asarray(w2).astype(io_dtype)
    assert w1.shape == (HIDDEN, IN_FEATURES) and w2.shape == (OUT_FEATURES, HIDDEN)
    b1 = jnp.asarray(b1).astype(jnp.float32).reshape(HIDDEN, 1)
    b2 = jnp.asarray(b2).astype(jnp.float32).reshape(OUT_FEATURES, 1)

    bb = _pick_batch_tile(B, block_b)
    grid = (pl.cdiv(B, bb),)

    isize = jnp.dtype(io_dtype).itemsize
    cost = pl.CostEstimate(
        flops=2 * B * (IN_FEATURES * HIDDEN + HIDDEN * OUT_FEATURES),
        transcendentals=0,
        bytes_accessed=(B * IN_FEATURES + B * OUT_FEATURES
                        + HIDDEN * IN_FEATURES + OUT_FEATURES * HIDDEN) * isize
                       + (HIDDEN + OUT_FEATURES) * 4,
    )

    out_fm = pl.pallas_call(
        _mlp_kernel,
        out_shape=jax.ShapeDtypeStruct((OUT_FEATURES, B), io_dtype),
        grid_spec=pltpu.PrefetchScalarGridSpec(
            num_scalar_prefetch=0,
            grid=grid,
            in_specs=[
                # x: batch-major (bb, 12) blocks read straight from HBM (contiguous rows).
                # If xprof ever shows exposed DMA here, add pipeline_mode=pl.Buffered(3).
                pl.BlockSpec((bb, IN_FEATURES), lambda i: (i, 0)),
                pl.BlockSpec((HIDDEN, IN_FEATURES), lambda i: (0, 0)),    # W1 (grid-invariant)
                pl.BlockSpec((HIDDEN, 1), lambda i: (0, 0)),              # b1
                pl.BlockSpec((OUT_FEATURES, HIDDEN), lambda i: (0, 0)),   # W2
                pl.BlockSpec((OUT_FEATURES, 1), lambda i: (0, 0)),        # b2
            ],
            out_specs=pl.BlockSpec((OUT_FEATURES, bb), lambda i: (0, i)),
        ),
        compiler_params=pltpu.CompilerParams(
            dimension_semantics=("parallel",),
            vmem_limit_bytes=vmem_limit_bytes,
        ),
        cost_estimate=cost,
    )(x, w1, b1, w2, b2)

    if feature_major_out:
        return out_fm                      # (2, B): lane-dense, fold the transpose downstream
    return out_fm.T                        # (B, 2): matches the PyTorch forward contract


def init_params(key):
    """nn.Linear-style init in PyTorch layout: W (out, in), b (out,)."""
    k1, k2, k3, k4 = jax.random.split(key, 4)
    bound1 = 1.0 / np.sqrt(IN_FEATURES)
    bound2 = 1.0 / np.sqrt(HIDDEN)
    w1 = jax.random.uniform(k1, (HIDDEN, IN_FEATURES), jnp.float32, -bound1, bound1)
    b1 = jax.random.uniform(k2, (HIDDEN,), jnp.float32, -bound1, bound1)
    w2 = jax.random.uniform(k3, (OUT_FEATURES, HIDDEN), jnp.float32, -bound2, bound2)
    b2 = jax.random.uniform(k4, (OUT_FEATURES,), jnp.float32, -bound2, bound2)
    return w1, b1, w2, b2


def reference(x, w1, b1, w2, b2):
    h = jnp.maximum(x @ w1.T + b1, 0.0)
    return h @ w2.T + b2


if __name__ == "__main__":
    key = jax.random.PRNGKey(0)
    kx1, kx2, kx3, kp = jax.random.split(key, 4)
    w1, b1, w2, b2 = init_params(kp)

    # Case 1: tiny batch -> single full-extent (unaligned) block.
    x_small = jax.random.normal(kx1, (10, IN_FEATURES), jnp.float32)
    ref_small = reference(x_small, w1, b1, w2, b2)
    out_small = jax.block_until_ready(soccer_goal_predictor(x_small, w1, b1, w2, b2))
    assert out_small.shape == (10, OUT_FEATURES)
    np.testing.assert_allclose(np.asarray(out_small), np.asarray(ref_small),
                               rtol=1e-2, atol=1e-2)

    # Kernel-native feature-major output (no wrapper transpose at all).
    out_fm = jax.block_until_ready(
        soccer_goal_predictor(x_small, w1, b1, w2, b2, feature_major_out=True))
    assert out_fm.shape == (OUT_FEATURES, 10)
    np.testing.assert_allclose(np.asarray(out_fm.T), np.asarray(ref_small),
                               rtol=1e-2, atol=1e-2)

    # Case 2: multi-step grid with a ragged (masked) final block -- no jnp.pad copies.
    x_med = jax.random.normal(kx2, (200, IN_FEATURES), jnp.float32)
    ref_med = reference(x_med, w1, b1, w2, b2)
    out_med = jax.block_until_ready(
        soccer_goal_predictor(x_med, w1, b1, w2, b2, block_b=128))   # grid=(2,), tail = 72 rows
    np.testing.assert_allclose(np.asarray(out_med), np.asarray(ref_med),
                               rtol=1e-2, atol=1e-2)

    # Case 3: native bf16 I/O path (producer supplies bf16), 2 lane-aligned grid steps.
    x_bf16 = jax.random.normal(kx3, (256, IN_FEATURES), jnp.float32).astype(jnp.bfloat16)
    ref_bf16 = reference(x_bf16.astype(jnp.float32), w1, b1, w2, b2)
    out_bf16 = jax.block_until_ready(soccer_goal_predictor(x_bf16, w1, b1, w2, b2))
    assert out_bf16.dtype == jnp.bfloat16 and out_bf16.shape == (256, OUT_FEATURES)
    np.testing.assert_allclose(np.asarray(out_bf16).astype(np.float32),
                               np.asarray(ref_bf16), rtol=5e-2, atol=5e-2)

    print("KERNEL_OK")
</pallas_src>

<mosaic_0001>
module attributes {stable_mosaic.version = 11 : i64} {
  func.func @_mlp_kernel(%arg0: i32, %arg1: memref<10x12xf32, #tpu.memory_space<vmem>>, %arg2: memref<64x12xf32, #tpu.memory_space<vmem>>, %arg3: memref<64x1xf32, #tpu.memory_space<vmem>>, %arg4: memref<2x64xf32, #tpu.memory_space<vmem>>, %arg5: memref<2x1xf32, #tpu.memory_space<vmem>>, %arg6: memref<2x10xf32, #tpu.memory_space<vmem>>) attributes {dimension_semantics = [#tpu.dimension_semantics<parallel>], iteration_bounds = array<i64: 1>, scalar_prefetch = 0 : i64, scratch_operands = 0 : i64, tpu.core_type = #tpu.core_type<tc>, window_params = [{transform_indices = @transform_0, window_bounds = array<i64: 10, 12>}, {pipeline_mode = #tpu.pipeline_mode<synchronous>, transform_indices = @transform_1, window_bounds = array<i64: 64, 12>}, {pipeline_mode = #tpu.pipeline_mode<synchronous>, transform_indices = @transform_2, window_bounds = array<i64: 64, 1>}, {pipeline_mode = #tpu.pipeline_mode<synchronous>, transform_indices = @transform_3, window_bounds = array<i64: 2, 64>}, {pipeline_mode = #tpu.pipeline_mode<synchronous>, transform_indices = @transform_4, window_bounds = array<i64: 2, 1>}, {transform_indices = @transform_5, window_bounds = array<i64: 2, 10>}]} {
    %c0 = arith.constant 0 : index
    %c0_0 = arith.constant 0 : index
    %0 = vector.load %arg1[%c0, %c0_0] : memref<10x12xf32, #tpu.memory_space<vmem>>, vector<10x12xf32>
    %1 = tpu.transpose %0, [1, 0] : vector<10x12xf32> -> vector<12x10xf32>
    %c0_1 = arith.constant 0 : index
    %c0_2 = arith.constant 0 : index
    %2 = vector.load %arg2[%c0_1, %c0_2] : memref<64x12xf32, #tpu.memory_space<vmem>>, vector<64x12xf32>
    %cst = arith.constant dense<0.000000e+00> : vector<64x10xf32>
    %3 = tpu.matmul %2, %1, %cst {dimension_numbers = #tpu.dot_dimension_numbers<[1], [0], [0], [1], [0, 0, 1, 1], [], []>} : vector<64x12xf32>, vector<12x10xf32>, vector<64x10xf32> -> vector<64x10xf32>
    %c0_3 = arith.constant 0 : index
    %c0_4 = arith.constant 0 : index
    %4 = vector.load %arg3[%c0_3, %c0_4] : memref<64x1xf32, #tpu.memory_space<vmem>>, vector<64x1xf32>
    %5 = vector.broadcast %4 : vector<64x1xf32> to vector<64x10xf32>
    %6 = arith.addf %3, %5 : vector<64x10xf32>
    %cst_5 = arith.constant 0.000000e+00 : f32
    %7 = vector.broadcast %cst_5 : f32 to vector<64x10xf32>
    %8 = arith.maximumf %6, %7 : vector<64x10xf32>
    %c0_6 = arith.constant 0 : index
    %c0_7 = arith.constant 0 : index
    %9 = vector.load %arg4[%c0_6, %c0_7] : memref<2x64xf32, #tpu.memory_space<vmem>>, vector<2x64xf32>
    %cst_8 = arith.constant dense<0.000000e+00> : vector<2x10xf32>
    %10 = tpu.matmul %9, %8, %cst_8 {dimension_numbers = #tpu.dot_dimension_numbers<[1], [0], [0], [1], [0, 0, 1, 1], [], []>} : vector<2x64xf32>, vector<64x10xf32>, vector<2x10xf32> -> vector<2x10xf32>
    %c0_9 = arith.constant 0 : index
    %c0_10 = arith.constant 0 : index
    %11 = vector.load %arg5[%c0_9, %c0_10] : memref<2x1xf32, #tpu.memory_space<vmem>>, vector<2x1xf32>
    %12 = vector.broadcast %11 : vector<2x1xf32> to vector<2x10xf32>
    %13 = arith.addf %10, %12 : vector<2x10xf32>
    %c0_11 = arith.constant 0 : index
    %c0_12 = arith.constant 0 : index
    %14 = vector.load %arg6[%c0_11, %c0_12] : memref<2x10xf32, #tpu.memory_space<vmem>>, vector<2x10xf32>
    tpu.vector_store %arg6[%c0_11, %c0_12], %13 {strides = array<i32>} : memref<2x10xf32, #tpu.memory_space<vmem>>, vector<2x10xf32>,
    return
  }
  func.func @transform_0(%arg0: i32) -> (i32, i32) {
    %c0_i32 = arith.constant 0 : i32
    %c0_i32_0 = arith.constant 0 : i32
    return %arg0, %c0_i32 : i32, i32
  }
  func.func @transform_1(%arg0: i32) -> (i32, i32) {
    %c0_i32 = arith.constant 0 : i32
    %c0_i32_0 = arith.constant 0 : i32
    %c0_i32_1 = arith.constant 0 : i32
    return %c0_i32, %c0_i32_0 : i32, i32
  }
  func.func @transform_2(%arg0: i32) -> (i32, i32) {
    %c0_i32 = arith.constant 0 : i32
    %c0_i32_0 = arith.constant 0 : i32
    %c0_i32_1 = arith.constant 0 : i32
    return %c0_i32, %c0_i32_0 : i32, i32
  }
  func.func @transform_3(%arg0: i32) -> (i32, i32) {
    %c0_i32 = arith.constant 0 : i32
    %c0_i32_0 = arith.constant 0 : i32
    %c0_i32_1 = arith.constant 0 : i32
    return %c0_i32, %c0_i32_0 : i32, i32
  }
  func.func @transform_4(%arg0: i32) -> (i32, i32) {
    %c0_i32 = arith.constant 0 : i32
    %c0_i32_0 = arith.constant 0 : i32
    %c0_i32_1 = arith.constant 0 : i32
    return %c0_i32, %c0_i32_0 : i32, i32
  }
  func.func @transform_5(%arg0: i32) -> (i32, i32) {
    %c0_i32 = arith.constant 0 : i32
    %c0_i32_0 = arith.constant 0 : i32
    return %c0_i32, %arg0 : i32, i32
  }
}

</mosaic_0001>

<bundles_post_ra>
// kernel: tpu_custom_call.1
= control target key start
LH: loop header
LB: loop body
LE: loop exit
PB: predicated region body
PF: predicated region fallthrough
CT: control target
= control target key end

     0   :  { %vm79_vm0 = vcmask 97280   ;;  %v254_v3 = vmov 0   ;;  %s363_s0 = inlined_call_operand.vmem [shape: f32[10,12], index: 0, kind: input, shape index: {}]   ;;  %s364_s1 = inlined_call_operand.vmem [shape: f32[64,12], index: 1, kind: input, shape index: {}]   ;;  %s365_s2 = inlined_call_operand.vmem [shape: f32[64,1], index: 2, kind: input, shape index: {}]   ;;  %s366_s3 = inlined_call_operand.vmem [shape: f32[2,64], index: 3, kind: input, shape index: {}]   ;;  %s367_s4 = inlined_call_operand.vmem [shape: f32[2,1], index: 4, kind: input, shape index: {}]   ;;  %s368_s5 = inlined_call_operand.hbm [shape: f32[2,10], index: 5, kind: output, shape index: {}]  }
   0x1   :  { %v22_v0 = vld [vmem:[%s363_s0 + $0x8] sm:$0x3]  ;;  %v38_v1 = vld [vmem:[%s365_s2 + $0x38] sm:$0xff]  ;;  %v21_v2 = vld [vmem:[%s363_s0] sm:$0xff]  ;;  %226 = vset.pattern.permute.xlu1 %v254_v3  ;;  %225 = vset.pattern.permute.xlu0 %v254_v3 }
   0x2   :  { %219 = vmatpush.xpose.msk.msra.mxu2 %vm79_vm0, %v22_v0  ;;  %220 = vmatpush.xpose.msk.msra.mxu3 %vm79_vm0, %v22_v0  ;;  %v36_v4 = vld [vmem:[%s365_s2 + $0x28] sm:$0xff]  ;;  %v26_v5 = vld [vmem:[%s364_s1 + $0x18] sm:$0xff]  ;;  %v29_v6 = vld [vmem:[%s364_s1 + $0x30] sm:$0xff] }
   0x3   :  { %208 = vmatpush.xpose.msk.msra.mxu0 %vm79_vm0, %v22_v0  ;;  %66 = vperm.xlu1 %226, %v36_v4   ;;  %v34_v7 = vld [vmem:[%s365_s2 + $0x18] sm:$0xff]  ;;  %v23_v8 = vld [vmem:[%s364_s1] sm:$0xff] }
   0x4   :  { %76 = vperm.xlu0 %225, %v38_v1   ;;  %227 = vset.pattern.permute.xlu2 %v254_v3 }
   0x5   :  { %56 = vperm.xlu2 %227, %v34_v7  }
   0x6   :  { %221 = vmatpush.xpose.msk.msra.mxu2 %vm79_vm0, %v21_v2  ;;  %222 = vmatpush.xpose.msk.msra.mxu3 %vm79_vm0, %v21_v2 }
   0x7   :  { %209 = vmatpush.xpose.msk.msra.mxu0 %vm79_vm0, %v21_v2 }
   0x8   :  { %10 = vsyncpa [#allocation3], 0  ;;  %v35_v9 = vld [vmem:[%s365_s2 + $0x20] sm:$0xff]  ;;  %v37_v10 = vld [vmem:[%s365_s2 + $0x30] sm:$0xff]  ;;  %vm166_vm1 = vcmask 523264   ;;  %s199_s7 = sshll.u32 %s368_s5, 4  ;;  %s200_s7 = int_to_ptr.hbm [resolvable:$true] %s199_s7 }
   0x9   :  { %213 = vmatmul.msk.f32.vlgmr.msra.gmra.mxu2 %vm79_vm0, %v26_v5  ;;  %216 = vmatmul.msk.f32.vlgmr.msra.gmra.mxu3 %vm79_vm0, %v29_v6  ;;  %v33_v11 = vld [vmem:[%s365_s2 + $0x10] sm:$0xff]  ;;  %v27_v12 = vld [vmem:[%s364_s1 + $0x20] sm:$0xff]  ;;  %v30_v13 = vld [vmem:[%s364_s1 + $0x38] sm:$0xff]  ;;  %vm190_vm2 = vcmask 74752  }
   0xa   :  { %210 = vmatmul.msk.f32.vlgmr.msra.gmra.mxu0 %vm79_vm0, %v23_v8  ;;  %v24_v14 = vld [vmem:[%s364_s1 + $0x8] sm:$0xff]  ;;  %v31_v15 = vld [vmem:[%s365_s2] sm:$0xff]  ;;  %v25_v19 = vld [vmem:[%s364_s1 + $0x10] sm:$0xff] }
   0xb   :  { %61 = vperm.xlu1 %226, %v35_v9   ;;  %v32_v16 = vld [vmem:[%s365_s2 + $0x8] sm:$0xff]  ;;  %v160_v17 = vld [vmem:[%s367_s4] sm:$0x3]  ;;  %s255_s4 = smov [#allocation2]  }
   0xc   :  { %71 = vperm.xlu0 %225, %v37_v10   ;;  %v28_v18 = vld [vmem:[%s364_s1 + $0x28] sm:$0xff]  ;;  %v159_v52 = vld [vmem:[%s366_s3] sm:$0x3]  ;;  %s197_s29 = sshll.u32 %s255_s4, 4  ;;  %s198_s29 = int_to_ptr.vmem [resolvable:$true] %s197_s29 }
   0xd   :  { %51 = vperm.xlu2 %227, %v33_v11  }
  0x11   :  { %214 = vmatmul.msk.f32.gmra.mxu2 %vm79_vm0, %v27_v12  ;;  %217 = vmatmul.msk.f32.gmra.mxu3 %vm79_vm0, %v30_v13 }
  0x12   :  { %211 = vmatmul.msk.f32.gmra.mxu0 %vm79_vm0, %v24_v14 }
  0x13   :  { %41 = vperm.xlu1 %226, %v31_v15  }
  0x14   :  { %46 = vperm.xlu0 %225, %v32_v16  }
  0x15   :  { %163 = vperm.xlu2 %227, %v160_v17  }
  0x19   :  { %215 = vmatmul.msk.f32.gmra.mxu2 %vm79_vm0, %v28_v18 }
  0x1a   :  { %212 = vmatmul.msk.f32.gmra.mxu0 %vm79_vm0, %v25_v19 }
  0x5f   :  { %v57_v31 = vpop.permute.xlu2 %56 }
  0x67   :  { %v52_v41 = vpop.permute.xlu2 %51 }
  0x6f   :  { %v164_v53 = vpop.permute.xlu2 %163 }
  0x75   :  { %v67_v24 = vpop.permute.xlu1 %66 }
  0x76   :  { %v77_v20 = vpop.permute.xlu0 %76 }
  0x7d   :  { %v62_v33 = vpop.permute.xlu1 %61 }
  0x7e   :  { %v72_v25 = vpop.permute.xlu0 %71 }
  0x85   :  { %v42_v45 = vpop.permute.xlu1 %41 }
  0x86   :  { %v47_v42 = vpop.permute.xlu0 %46 }
  0x87   :  { %v127_v21 = vpop.f32.mrf.mxu0 }
  0x88   :  { %v128_v48 = vadd.f32 %v127_v21, %v42_v45 }
  0x8a   :  { %v151_v51 = vmax.f32 %v128_v48, 0.0 }
  0x8c   :  { %v136_v22 = vpop.f32.mrf.mxu2  ;;  %v145_v23 = vpop.f32.mrf.mxu3 }
  0x8d   :  { %v146_v29 = vadd.f32 %v145_v23, %v72_v25  ;;  %v137_v39 = vadd.f32 %v136_v22, %v57_v31 }
  0x8f   :  { %v130_v26 = vpop.f32.mrf.mxu0  ;;  %v157_v34 = vmax.f32 %v146_v29, 0.0  ;;  %v154_v46 = vmax.f32 %v137_v39, 0.0 }
  0x90   :  { %v131_v47 = vadd.f32 %v130_v26, %v47_v42 }
  0x92   :  { %v152_v50 = vmax.f32 %v131_v47, 0.0 }
  0x94   :  { %v139_v27 = vpop.f32.mrf.mxu2  ;;  %v148_v28 = vpop.f32.mrf.mxu3 }
  0x95   :  { %v149_v30 = vadd.f32 %v148_v28, %v77_v20  ;;  %v140_v36 = vadd.f32 %v139_v27, %v62_v33 }
  0x97   :  { %v158_v32 = vmax.f32 %v149_v30, 0.0  ;;  %v133_v38 = vpop.f32.mrf.mxu0  ;;  %v155_v43 = vmax.f32 %v140_v36, 0.0 }
  0x98   :  { %v134_v44 = vadd.f32 %v133_v38, %v52_v41 }
  0x99   :  { %178 = vmatpush.msra.mxu1 %v158_v32 }
  0x9a   :  { %v153_v49 = vmax.f32 %v134_v44, 0.0 }
  0x9b   :  { %179 = vmatpush.msra.mxu1 %v157_v34 }
  0x9c   :  { %v142_v35 = vpop.f32.mrf.mxu2 }
  0x9d   :  { %v143_v37 = vadd.f32 %v142_v35, %v67_v24 }
  0x9f   :  { %v156_v40 = vmax.f32 %v143_v37, 0.0 }
  0xa1   :  { %180 = vmatpush.msra.mxu1 %v156_v40 }
  0xa3   :  { %181 = vmatpush.msra.mxu1 %v155_v43 }
  0xa5   :  { %182 = vmatpush.msra.mxu1 %v154_v46 }
  0xa7   :  { %183 = vmatpush.msra.mxu1 %v153_v49 }
  0xa9   :  { %184 = vmatpush.msra.mxu1 %v152_v50 }
  0xab   :  { %185 = vmatpush.msra.mxu1 %v151_v51 }
  0xac   :  { %218 = vmatmul.msk.f32.vlgmr.msra.gmra.mxu1 %vm166_vm1, %v159_v52 }
 0x129   :  { %v187_v54 = vpop.f32.mrf.mxu1 }
 0x12a   :  { %v188_v55 = vadd.f32 %v187_v54, %v164_v53 }
 0x12c   :  { %191 = vst.msk [vmem:[#allocation2] sm:$0x3] %vm190_vm2, %v188_v55 }
 0x12d   :  { %202 = dma.vmem_to_hbm [thread:$0]  %s198_s29, 32, %s200_s7, [#allocation3]  }
 0x12e   :  { %252 = dma.done.wait [#allocation3], 32  }
 0x12f   :  { %253 = vsyncadd [#allocation3], 4294967264 }
 0x130   :  { %207 = vsyncpa [#allocation3], 1 }

</bundles_post_ra>
